<compile_context>
chip_gen: v6e
topology: v6e:2x2x1
jax: 0.10.0
libtpu: 0.0.40
codegen_flags: <defaults>
</compile_context>

<pallas_src>
import functools

import jax
import jax.numpy as jnp
from jax.experimental import pallas as pl
from jax.experimental.pallas import tpu as pltpu


def _patch_embed_kernel(x_ref, w_ref, b_ref, o_ref):
    # x_ref: (TM, K) patch rows; w_ref: (K, N); b_ref: (1, N) f32; o_ref: (TM, N).
    acc = jnp.dot(x_ref[...], w_ref[...], preferred_element_type=jnp.float32)
    o_ref[...] = (acc + b_ref[...]).astype(o_ref.dtype)


def _round_up(v, m):
    return -(-v // m) * m


def _choose_tile_m(M, K, N, lhs_itemsize, out_itemsize):
    # VMEM lays tiles out with the last dim padded to 128 lanes, so size with
    # padded widths (K=48 -> 128, N=96 -> 128), not the raw K/N.
    k_pad = _round_up(K, 128)
    n_pad = _round_up(N, 128)
    row_bytes = k_pad * lhs_itemsize + n_pad * out_itemsize
    # ~8 MiB budget for the double-buffered streamed LHS + output tiles; the
    # VMEM-resident (also double-buffered) weight/bias blocks and compiler
    # scratch are tiny and fit comfortably inside the 32 MiB vmem limit and
    # v7x's 64 MiB physical VMEM.
    tm = (8 * 1024 * 1024) // (2 * row_bytes)
    # Cap at 4096 rows (>= ~1 MB per-step DMA on v7x's 3.2 TB/s HBM) and force
    # >= 4 grid steps so the pipeline actually overlaps and v7x's two
    # TensorCores both receive work; 1-2k rows already sits at the HBM roofline.
    tm = min(tm, 4096, max(1, -(-M // 4)))
    # 16-row granularity keeps bf16 tiles on native (16, 128) sublane packing.
    tm = max(16, (tm // 16) * 16)
    return min(tm, M)


@functools.partial(
    jax.jit, static_argnames=("patch_size", "out_dtype", "compute_dtype"))
def patch_embed_forward(x, weight, bias, *, patch_size=4,
                        out_dtype=jnp.bfloat16, compute_dtype=jnp.bfloat16):
    """PatchEmbed forward.

    x: (B, C, H, W). weight: (embed_dim, C, p, p). bias: (embed_dim,).
    Returns (out, (Ho, Wo)) with out: (B, Ho*Wo, embed_dim), dtype == out_dtype.

    out_dtype defaults to bfloat16 (the kernel is HBM-writeback bound and the
    LayerNorm/Linear that follow in Swin tolerate bf16); pass jnp.float32 for
    full-width output.  compute_dtype controls the MXU operand precision.
    """
    B, C, H, W = x.shape
    p = patch_size
    Ho, Wo = H // p, W // p
    N = weight.shape[0]
    K = C * p * p
    M = B * Ho * Wo

    # Conv2d with kernel=stride=p silently drops trailing rows/cols when H or W
    # is not a multiple of p; match that exactly (no-op for divisible inputs).
    if H != Ho * p or W != Wo * p:
        x = x[:, :, : Ho * p, : Wo * p]

    # Patch extraction in (c, kh, kw) order (matches Conv2d OIHW weight layout).
    # Cast to compute_dtype so the materialized patch matrix + kernel LHS
    # stream are half-width.  TODO(synk): fuse this gather into the kernel.
    patches = x.reshape(B, C, Ho, p, Wo, p)
    patches = patches.transpose(0, 2, 4, 1, 3, 5)        # (B, Ho, Wo, C, p, p)
    patches = patches.reshape(M, K).astype(compute_dtype)

    w2d = weight.reshape(N, K).T.astype(compute_dtype)   # (K, N), cast once
    b2d = bias.astype(jnp.float32).reshape(1, N)         # bias added in f32

    tm = _choose_tile_m(M, K, N,
                        jnp.dtype(compute_dtype).itemsize,
                        jnp.dtype(out_dtype).itemsize)
    grid = (pl.cdiv(M, tm),)

    out = pl.pallas_call(
        _patch_embed_kernel,
        out_shape=jax.ShapeDtypeStruct((M, N), out_dtype),
        grid=grid,
        in_specs=[
            pl.BlockSpec((tm, K), lambda i: (i, 0)),     # streamed LHS tiles
            pl.BlockSpec((K, N), lambda i: (0, 0)),      # weight: VMEM-resident
            pl.BlockSpec((1, N), lambda i: (0, 0)),      # bias:   VMEM-resident
        ],
        out_specs=pl.BlockSpec((tm, N), lambda i: (i, 0)),
        compiler_params=pltpu.CompilerParams(
            dimension_semantics=("parallel",),           # megacore split on v7x
            vmem_limit_bytes=32 * 1024 * 1024,
        ),
    )(patches, w2d, b2d)

    return out.reshape(B, Ho * Wo, N), (Ho, Wo)


if __name__ == "__main__":
    # Small deterministic config: B=2, C=4, H=W=16, patch=4, embed_dim=32.
    B, C, H, W = 2, 4, 16, 16
    patch_size = 4
    embed_dim = 32

    key = jax.random.PRNGKey(0)
    kx, kw, kb = jax.random.split(key, 3)
    x = jax.random.normal(kx, (B, C, H, W), dtype=jnp.float32)
    weight = jax.random.normal(
        kw, (embed_dim, C, patch_size, patch_size), dtype=jnp.float32) * 0.02
    bias = jax.random.normal(kb, (embed_dim,), dtype=jnp.float32) * 0.02

    out, (Ho, Wo) = patch_embed_forward(x, weight, bias, patch_size=patch_size)
    out = jax.block_until_ready(out)
    out_f32 = out.astype(jnp.float32)

    p = patch_size
    # Reference 1: emulation of the kernel math (bf16 operands, f32 accumulate).
    patches = x.reshape(B, C, H // p, p, W // p, p).transpose(0, 2, 4, 1, 3, 5)
    patches = patches.reshape(-1, C * p * p).astype(jnp.bfloat16).astype(jnp.float32)
    w2d = weight.reshape(embed_dim, -1).T.astype(jnp.bfloat16).astype(jnp.float32)
    ref_gemm = jnp.dot(patches, w2d, precision=jax.lax.Precision.HIGHEST) + bias[None, :]
    ref_gemm = ref_gemm.reshape(B, -1, embed_dim)

    # Reference 2: true conv semantics in f32 (loose tolerance covers bf16
    # operands + bf16 output rounding).
    ref_conv = jax.lax.conv_general_dilated(
        x, weight, window_strides=(p, p), padding="VALID",
        dimension_numbers=("NCHW", "OIHW", "NCHW"),
        precision=jax.lax.Precision.HIGHEST,
    ) + bias[None, :, None, None]
    ref_conv = ref_conv.reshape(B, embed_dim, -1).transpose(0, 2, 1)

    assert out.shape == (B, (H // p) * (W // p), embed_dim)
    assert out.dtype == jnp.bfloat16
    assert (Ho, Wo) == (H // p, W // p)
    assert jnp.allclose(out_f32, ref_gemm, atol=2e-2, rtol=2e-2)
    assert jnp.allclose(out_f32, ref_conv, atol=3e-2, rtol=3e-2)

    # Also exercise the full-precision output path once.
    out32, _ = patch_embed_forward(x, weight, bias, patch_size=patch_size,
                                   out_dtype=jnp.float32)
    out32 = jax.block_until_ready(out32)
    assert out32.dtype == jnp.float32
    assert jnp.allclose(out32, ref_gemm, atol=1e-3, rtol=1e-3)

    print("KERNEL_OK")
</pallas_src>

<mosaic_0001>
module attributes {stable_mosaic.version = 11 : i64} {
  func.func @_patch_embed_kernel(%arg0: i32, %arg1: memref<16x64xbf16, #tpu.memory_space<vmem>>, %arg2: memref<64x32xbf16, #tpu.memory_space<vmem>>, %arg3: memref<1x32xf32, #tpu.memory_space<vmem>>, %arg4: memref<16x32xbf16, #tpu.memory_space<vmem>>) attributes {dimension_semantics = [#tpu.dimension_semantics<parallel>], iteration_bounds = array<i64: 2>, scalar_prefetch = 0 : i64, scratch_operands = 0 : i64, tpu.core_type = #tpu.core_type<tc>, window_params = [{transform_indices = @transform_0, window_bounds = array<i64: 16, 64>}, {pipeline_mode = #tpu.pipeline_mode<synchronous>, transform_indices = @transform_1, window_bounds = array<i64: 64, 32>}, {pipeline_mode = #tpu.pipeline_mode<synchronous>, transform_indices = @transform_2, window_bounds = array<i64: 1, 32>}, {transform_indices = @transform_3, window_bounds = array<i64: 16, 32>}]} {
    %c0 = arith.constant 0 : index
    %c0_0 = arith.constant 0 : index
    %0 = vector.load %arg1[%c0, %c0_0] : memref<16x64xbf16, #tpu.memory_space<vmem>>, vector<16x64xbf16>
    %c0_1 = arith.constant 0 : index
    %c0_2 = arith.constant 0 : index
    %1 = vector.load %arg2[%c0_1, %c0_2] : memref<64x32xbf16, #tpu.memory_space<vmem>>, vector<64x32xbf16>
    %cst = arith.constant dense<0.000000e+00> : vector<16x32xf32>
    %2 = tpu.matmul %0, %1, %cst {dimension_numbers = #tpu.dot_dimension_numbers<[1], [0], [0], [1], [0, 0, 1, 1], [], []>} : vector<16x64xbf16>, vector<64x32xbf16>, vector<16x32xf32> -> vector<16x32xf32>
    %c0_3 = arith.constant 0 : index
    %c0_4 = arith.constant 0 : index
    %3 = vector.load %arg3[%c0_3, %c0_4] : memref<1x32xf32, #tpu.memory_space<vmem>>, vector<1x32xf32>
    %4 = vector.broadcast %3 : vector<1x32xf32> to vector<16x32xf32>
    %5 = arith.addf %2, %4 : vector<16x32xf32>
    %6 = arith.truncf %5 : vector<16x32xf32> to vector<16x32xbf16>
    %c0_5 = arith.constant 0 : index
    %c0_6 = arith.constant 0 : index
    %7 = vector.load %arg4[%c0_5, %c0_6] : memref<16x32xbf16, #tpu.memory_space<vmem>>, vector<16x32xbf16>
    tpu.vector_store %arg4[%c0_5, %c0_6], %6 {strides = array<i32>} : memref<16x32xbf16, #tpu.memory_space<vmem>>, vector<16x32xbf16>,
    return
  }
  func.func @transform_0(%arg0: i32) -> (i32, i32) {
    %c0_i32 = arith.constant 0 : i32
    %c0_i32_0 = arith.constant 0 : i32
    return %arg0, %c0_i32 : i32, i32
  }
  func.func @transform_1(%arg0: i32) -> (i32, i32) {
    %c0_i32 = arith.constant 0 : i32
    %c0_i32_0 = arith.constant 0 : i32
    %c0_i32_1 = arith.constant 0 : i32
    return %c0_i32, %c0_i32_0 : i32, i32
  }
  func.func @transform_2(%arg0: i32) -> (i32, i32) {
    %c0_i32 = arith.constant 0 : i32
    %c0_i32_0 = arith.constant 0 : i32
    %c0_i32_1 = arith.constant 0 : i32
    return %c0_i32, %c0_i32_0 : i32, i32
  }
  func.func @transform_3(%arg0: i32) -> (i32, i32) {
    %c0_i32 = arith.constant 0 : i32
    %c0_i32_0 = arith.constant 0 : i32
    return %arg0, %c0_i32 : i32, i32
  }
}

</mosaic_0001>

<bundles_post_ra>
// kernel: patch_embed_forward.1
= control target key start
LH: loop header
LB: loop body
LE: loop exit
PB: predicated region body
PF: predicated region fallthrough
CT: control target
= control target key end

     0   :  { %8 = vsyncpa [#allocation3], 0  ;;  %s643_s0 = inlined_call_operand.vmem [shape: bf16[32,64], index: 0, kind: input, shape index: {}]   ;;  %s644_s1 = inlined_call_operand.vmem [shape: bf16[64,32], index: 1, kind: input, shape index: {}]   ;;  %s645_s2 = inlined_call_operand.vmem [shape: f32[1,32], index: 2, kind: input, shape index: {}]   ;;  %s646_s3 = inlined_call_operand.hbm [shape: bf16[32,32], index: 3, kind: output, shape index: {}]  }
   0x1   :  { %10 = vsyncpa [#allocation3 + $0x1], 0  ;;  %s527_s12 = smov 0   ;;  %s529_s13 = smov 0  }
   0x2   :  { %s531_s14 = smov 0   ;;  %s533_s15 = smov 0  }
   0x3 LB: > { %s548_s16 = sadd.s32 4294967295, %s500_s15   ;;  %s351_s17 = sadd.s32 4294967294, %s500_s15   ;;  %s500_s15 = sphi %s533_s15, %s652_s15   ;;  %s496_s14 = sphi %s531_s14, %s651_s14   ;;  %s492_s13 = sphi %s529_s13, %s650_s13   ;;  %s488_s12 = sphi %s527_s12, %s649_s12  }
   0x4   : > { %s552_s18 = sadd.s32 1, %s500_s15   ;;  %s91_s19 = sadd.s32 1, %s496_s14 }
   0x5   : > { %s88_s20 = ssub.s32 %s500_s15, %s552_s18  ;;  %p101_p0 = scmp.ne.s32.totalorder %s496_s14, %s492_s13 }
   0x6   : > { %p89_p1 = scmp.eq.s32.totalorder %s88_s20, 0  ;;  %p102_p2 = scmp.eq.s32.totalorder %s548_s16, 1 }
   0x7   : > { %p107_p3 = scmp.ne.s32.totalorder %s492_s13, %s488_s12  ;;  %p108_p4 = scmp.eq.s32.totalorder %s351_s17, 1 }
   0x8   : > { %s563_s21 = scalar_select %p89_p1, %s496_s14, %s91_s19  }
   0x9   : > { %p565_p5 = por %p102_p2, %p101_p0  ;;  %p569_p6 = por %p108_p4, %p107_p3 }
   0xa   : > { %p354_p7 = scmp.ge.s32.totalorder %s500_s15, 1  ;;  %p141_p8 = scmp.lt.s32.totalorder %s500_s15, 3 }
   0xc   : > { %p142_p9 = pnand %p354_p7, %p141_p8 }
   0xd   : > { %s356_s28 = sshll.u32 (!%p142_p9), %s548_s16, 1  ;;  %s162_s10 = sand.u32 (!%p142_p9), 1, %s492_s13  }
   0xe   : > { %145 = sbr.rel (%p142_p9) target bundleno = 251 (0xfb), region = 32  ;;  %p166_p10 = scmp.lt.s32.totalorder (!%p142_p9), %s356_s28, 3 }
   0xf   : > { %s355_s19 = sshll.u32 (!%p142_p9), %s162_s10, 3  ;;  %s374_s25 = sshll.u32 (!%p142_p9), %s548_s16, 7 }
  0x10   : > { %s164_s20 = scalar_lea.vmem (!%p142_p9), [#allocation2], %s355_s19  ;;  %s603_s29 = scalar_lea.sflag (!%p142_p9), [#allocation3], %s162_s10 }
  0x11   : > { %s289_s24 = sshll.u32 (!%p142_p9), %s164_s20, 4  ;;  %s504_s16 = smov (!%p142_p9), [#allocation2]   ;;  %s596_s24 = int_to_ptr.vmem [resolvable:$true] %s289_s24 }
  0x12   : > { %s440_s30 = scalar_lea.vmem (!%p142_p9), %s596_s24, 128 }
  0x13   : > { %v435_v0 = vld [vmem:[%s644_s1 + $0x18] sm:$0xff]   ;;  %v502_v1 = vmov 0.0   ;;  %v436_v2 = vld [vmem:[%s644_s1 + $0x10] sm:$0xff]   ;;  %vm503_vm0 = vmmov 0   ;;  %s654_s28 = smov (!%p166_p10, %s356_s28), 3  ;;  %v437_v3 = vld [vmem:[%s644_s1 + $0x8] sm:$0xff]   ;;  %p441_p11 = scmp.ne.s32.totalorder %s596_s24, %s440_s30 }
  0x14   : > { %380 = vmatprep.subr.bf16.mxu0 %v502_v1  ;;  %388 = vmatprep.mubr.msk.bf16.mxu0 %vm503_vm0, %v502_v1  ;;  %s357_s4 = sshll.u32 %s654_s28, 2  ;;  %v438_v4 = vld [vmem:[%s644_s1] sm:$0xff]   ;;  %vm219_vm1 = vcmask 523264   ;;  %vm272_vm2 = vcmask 257024   ;;  %s601_s28 = scalar_lea.hbm %s646_s3, %s374_s25 }
  0x15   : > { %381 = vmatpush3.bf16.msra.mxu0 %v435_v0  ;;  %s169_s7 = scalar_lea.vmem %s643_s0, %s357_s4  ;;  %v358_v6 = vld [vmem:[%s645_s2] ss:$0 sm:$0xff]  ;;  %p442_p12 = pnand %p441_p11, %p565_p5 }
  0x16   : > { %382 = vmatprep.subr.bf16.mxu0 %v502_v1  ;;  %v439_v5 = vld [vmem:[%s169_s7] sm:$0xff]   ;;  %s444_s4 = sshll.u32 %s504_s16, 4  ;;  %s445_s4 = int_to_ptr.vmem [resolvable:$false] %s444_s4 }
  0x17   : > { %p443_p13 = pneg %p442_p12  ;;  %s446_s5 = scalar_lea.vmem %s445_s4, 256 }
  0x18   : > { %p447_p0 = scmp.lt.s32.totalorder %s596_s24, %s445_s4  ;;  %p448_p1 = scmp.lt.s32.totalorder %s446_s5, %s440_s30 }
  0x19   : > { %383 = vmatpush3.bf16.msra.mxu0 %v436_v2 }
  0x1a   : > { %384 = vmatprep.subr.bf16.mxu0 %v502_v1  ;;  %p449_p2 = por %p448_p1, %p447_p0 }
  0x1c   : > { %p450_p3 = pnand %p449_p2, %p443_p13 }
  0x1d   : > { %385 = vmatpush3.bf16.msra.mxu0 %v437_v3 }
  0x1e   : > { %386 = vmatprep.subr.bf16.mxu0 %v502_v1 }
  0x21   : > { %387 = vmatpush3.bf16.msra.mxu0 %v438_v4 }
  0x24   : > { %389 = vmatmul.mubr.msk.bf16.vlgmr.msra.gmra.mxu0 %vm219_vm1, %v439_v5 }
  0xe4   : > { %v257_v7 = vpop.f32.mrf.mxu0 }
  0xe5   : > { %v258_v8 = vadd.f32 %v358_v6, %v257_v7 }
  0xe6   : > { %v390_v9 = vpop.f32.mrf.mxu0 }
  0xe7   : > { %v372_v10 = vpack.c.bf16 %v258_v8, %v258_v8 }
  0xe8   : > { %v260_v11 = vpop.f32.mrf.mxu0 }
  0xe9   : > { %273 = vst.msk [vmem:[%s164_s20] sm:$0xf] %vm272_vm2, %v372_v10  ;;  %v261_v12 = vadd.f32 %v358_v6, %v260_v11 }
  0xea   : > { %v391_v13 = vpop.f32.mrf.mxu0 }
  0xeb   : > { %v373_v14 = vpack.c.bf16 %v261_v12, %v261_v12 }
  0xed   : > { %274 = vst.msk [vmem:[%s164_s20 + $0x4] sm:$0xf] %vm272_vm2, %v373_v14 }
  0xee   : > { %453 = shalt.err (!%p450_p3)
}
  0xef   : > { %s454_s6 = scalar_lea.hbm %s601_s28, 128  ;;  %s458_s9 = scalar_lea.hbm %s646_s3, 256 }
  0xf0   : > { %p455_p4 = scmp.ne.s32.totalorder %s601_s28, %s454_s6  ;;  %p459_p9 = scmp.lt.s32.totalorder %s601_s28, %s646_s3 }
  0xf1   : > { %p460_p10 = scmp.lt.s32.totalorder %s458_s9, %s454_s6 }
  0xf2   : > { %p456_p7 = pnand %p455_p4, %p565_p5 }
  0xf3   : > { %p461_p11 = por %p460_p10, %p459_p9 }
  0xf4   : > { %p457_p8 = pneg %p456_p7 }
  0xf6   : > { %p462_p12 = pnand %p461_p11, %p457_p8 }
  0xf8   : > { %465 = shalt.err (!%p462_p12)
}
  0xf9   : > { %s505_s17 = smov 64   ;;  %s506_s19 = smov 4  }
  0xfa   : > { %392 = dma.vmem_to_hbm [thread:$0]  (%p565_p5), %s596_s24, 128, %s601_s28, %s603_s29, %s505_s17, %s505_s17, %s506_s19  }
  0xfb PF: > { %p398_p13 = scmp.ge.s32.totalorder %s500_s15, 2  ;;  %s304_s20 = sand.u32 1, %s488_s12  }
  0xfc   : > { %s305_s25 = scalar_lea.sflag [#allocation3], %s304_s20 }
  0xfd   : > { %p395_p0 = pnand %p398_p13, %p569_p6 }
  0xff   : > { %p396_p1 = pneg %p395_p0 }
 0x101   : > { %483 = dma.done.wait (%p396_p1), %s305_s25, 128  }
 0x102   : > { %485 = vsyncadd (%p396_p1), %s305_s25, 4294967168  ;;  %p13_p2 = scmp.ge.s32.totalorder %s552_s18, 4   ;;  %s649_s12 = smov %s492_s13 }
 0x103   : > { %s650_s13 = smov %s496_s14  ;;  %s651_s14 = smov %s563_s21 }
 0x104   : > { %s652_s15 = smov %s552_s18  ;;  %15 = sbr.rel (!%p13_p2) target bundleno = 3 (0x3), region = 67 }
 0x109   :  { %310 = vsyncpa [#allocation3], 1 }
 0x10a   :  { %312 = vsyncpa [#allocation3 + $0x1], 1 }

</bundles_post_ra>
